<compile_context>
chip_gen: v6e
topology: v6e:2x2x1
jax: 0.10.0
libtpu: 0.0.40
codegen_flags: <defaults>
</compile_context>

<pallas_src>
import functools

import jax
import jax.numpy as jnp
from jax.experimental import pallas as pl
from jax.experimental.pallas import tpu as pltpu


def _round_up(x, m):
    return ((x + m - 1) // m) * m


def _largest_divisor_tile(dim, cap, granule):
    """Largest multiple of `granule` that divides `dim` and is <= cap.

    `dim` must already be a multiple of `granule`.  The loop is at most
    cap/granule iterations (tiny)."""
    best = granule
    cap = min(cap, dim)
    t = granule
    while t <= cap:
        if dim % t == 0:
            best = t
        t += granule
    return best


def _linear_act_kernel(x_ref, wt_ref, b_ref, o_ref, *, activation, mxu_dtype):
    # x_ref:  (tm, tk)  VMEM  -- input tile
    # wt_ref: (tk, tn)  VMEM  -- pre-transposed weight tile (K, N layout)
    # b_ref:  (1, tn)   VMEM  -- bias tile
    # o_ref:  (tm, tn)  VMEM  -- f32 output tile, resident across the K axis,
    #                            used directly as the accumulator.
    k = pl.program_id(2)

    @pl.when(k == 0)
    def _():
        o_ref[...] = jnp.zeros_like(o_ref)

    x_t = x_ref[...]
    w_t = wt_ref[...]
    if mxu_dtype is not None:
        # Optional bf16 MXU path; accumulation stays f32.
        x_t = x_t.astype(mxu_dtype)
        w_t = w_t.astype(mxu_dtype)

    o_ref[...] += jnp.dot(x_t, w_t, preferred_element_type=jnp.float32)

    @pl.when(k == pl.num_programs(2) - 1)
    def _():
        z = o_ref[...] + b_ref[...]          # (1, tn) broadcasts over rows
        if activation == "sigmoid":
            o_ref[...] = jax.nn.sigmoid(z)   # EUP exp/recip: free vs MXU loop
        else:
            # Matches the PyTorch module: any other string falls back to ReLU.
            o_ref[...] = jnp.maximum(z, 0.0)


def prepare_linear_params(w, b):
    """One-time, per-layer parameter prep (do NOT call per forward pass).

    * Pads in/out features to multiples of 128 (lane granularity).
    * Pre-transposes the weight to (K, N) so the kernel never needs a
      per-K-step XLU transpose and never re-pads the weight per call.
    """
    out_features, in_features = w.shape
    K = _round_up(in_features, 128)
    N = _round_up(out_features, 128)

    wp = w
    if (N, K) != (out_features, in_features):
        wp = jnp.pad(w, ((0, N - out_features), (0, K - in_features)))
    wt = jnp.transpose(wp)                       # (K, N), one-time transpose

    bp = b.reshape(1, out_features)
    if N != out_features:
        bp = jnp.pad(bp, ((0, 0), (0, N - out_features)))

    return {
        "wt": wt.astype(jnp.float32),            # (K, N)
        "b": bp.astype(jnp.float32),             # (1, N)
        "in_features": in_features,
        "out_features": out_features,
    }


def linear_w_activation(x, params, activation="sigmoid", *,
                        tm_cap=512, tn_cap=512, tk_cap=1024,
                        resident_m_max=512, mxu_dtype=None,
                        vmem_limit_bytes=None):
    """Forward pass of LinearWActivation: activation(x @ W^T + b).

    x:      (batch, in_features) float32
    params: output of prepare_linear_params(w, b)
    """
    wt, bp = params["wt"], params["b"]
    in_features = params["in_features"]
    out_features = params["out_features"]
    K, N = wt.shape
    batch = x.shape[0]
    assert x.shape[1] == in_features, "feature-dim mismatch"
    x = x.astype(jnp.float32)

    # ---- tile selection -----------------------------------------------
    # N / K were padded to 128-multiples once at prepare time; pick tiles that
    # divide them exactly, so no MXU work or HBM bytes are wasted on padding.
    tn = _largest_divisor_tile(N, tn_cap, 128)
    tk = _largest_divisor_tile(K, tk_cap, 128)

    # Small-batch fast path: whole M dimension resident -> the weight matrix
    # (usually the big operand) is streamed from HBM exactly once.
    M8 = _round_up(batch, 8)
    if M8 <= resident_m_max:
        tm, M = M8, M8
    else:
        tm = _largest_divisor_tile(M8, tm_cap, 8)
        if tm >= 128:
            M = M8                      # exact divisor -> zero padded-M waste
        else:
            tm = 256                    # awkward batch: pad minimally instead
            M = _round_up(batch, tm)

    # Keep >= 2 parallel (i, j) tiles when possible so v7x's second TensorCore
    # has work (neutral on single-core v5e/v6e).
    if (M // tm) * (N // tn) == 1 and tn % 256 == 0:
        tn //= 2

    grid = (M // tm, N // tn, K // tk)

    # ---- per-call padding (cheap: activations only) ---------------------
    if (M, K) != (batch, in_features):
        xp = jnp.pad(x, ((0, M - batch), (0, K - in_features)))
    else:
        xp = x

    kernel = functools.partial(_linear_act_kernel,
                               activation=activation, mxu_dtype=mxu_dtype)

    cost = pl.CostEstimate(
        flops=2 * M * N * K,
        transcendentals=M * N if activation == "sigmoid" else 0,
        # x is re-streamed once per N-tile, the weight once per M-tile.
        bytes_accessed=4 * (M * K * (N // tn) + K * N * (M // tm) + M * N),
    )

    out = pl.pallas_call(
        kernel,
        out_shape=jax.ShapeDtypeStruct((M, N), jnp.float32),
        grid_spec=pltpu.PrefetchScalarGridSpec(
            num_scalar_prefetch=0,
            grid=grid,
            in_specs=[
                pl.BlockSpec((tm, tk), lambda i, j, k: (i, k)),   # x
                pl.BlockSpec((tk, tn), lambda i, j, k: (k, j)),   # W^T (K, N)
                pl.BlockSpec((1, tn), lambda i, j, k: (0, j)),    # bias
            ],
            out_specs=pl.BlockSpec((tm, tn), lambda i, j, k: (i, j)),
        ),
        compiler_params=pltpu.CompilerParams(
            dimension_semantics=("parallel", "parallel", "arbitrary"),
            vmem_limit_bytes=vmem_limit_bytes,
        ),
        cost_estimate=cost,
    )(xp, wt, bp)

    if (M, N) != (batch, out_features):
        out = out[:batch, :out_features]
    return out


def _init_linear_params(key, in_features, out_features):
    # Mimics PyTorch nn.Linear default init:
    # U(-1/sqrt(in_features), 1/sqrt(in_features)) for both weight and bias.
    kw, kb = jax.random.split(key)
    bound = 1.0 / jnp.sqrt(jnp.float32(in_features))
    w = jax.random.uniform(
        kw, (out_features, in_features), jnp.float32, -bound, bound)
    b = jax.random.uniform(kb, (out_features,), jnp.float32, -bound, bound)
    return w, b


def _ref_forward(x, w, b, activation):
    z = jnp.dot(x, w.T, precision=jax.lax.Precision.HIGHEST) + b
    return jax.nn.sigmoid(z) if activation == "sigmoid" else jnp.maximum(z, 0.0)


if __name__ == "__main__":
    key = jax.random.PRNGKey(0)
    k_x, k_p = jax.random.split(key)

    # ---- small demo shapes (module-consistent) --------------------------
    batch, in_features, out_features = 8, 32, 16
    x = jax.random.normal(k_x, (batch, in_features), jnp.float32)
    w, b = _init_linear_params(k_p, in_features, out_features)
    params = prepare_linear_params(w, b)

    y = jax.block_until_ready(linear_w_activation(x, params, "sigmoid"))
    assert y.shape == (batch, out_features)
    assert jnp.allclose(y, _ref_forward(x, w, b, "sigmoid"), atol=2e-3, rtol=2e-3)

    y_relu = jax.block_until_ready(linear_w_activation(x, params, "relu"))
    assert jnp.allclose(y_relu, _ref_forward(x, w, b, "relu"),
                        atol=2e-3, rtol=2e-3)

    # ---- moderate shapes: exercise all three grid axes and the tiled-M path
    # (batch > resident_m_max, K grid > 1, N grid > 1, non-128-multiple dims).
    k_x2, k_p2 = jax.random.split(jax.random.PRNGKey(1))
    B2, FIN2, FOUT2 = 600, 1700, 520
    x2 = jax.random.normal(k_x2, (B2, FIN2), jnp.float32)
    w2, b2 = _init_linear_params(k_p2, FIN2, FOUT2)
    params2 = prepare_linear_params(w2, b2)
    y2 = jax.block_until_ready(linear_w_activation(x2, params2, "sigmoid"))
    assert y2.shape == (B2, FOUT2)
    assert jnp.allclose(y2, _ref_forward(x2, w2, b2, "sigmoid"),
                        atol=5e-3, rtol=5e-3)

    print("KERNEL_OK")
</pallas_src>

<mosaic_0001>
module attributes {stable_mosaic.version = 11 : i64} {
  func.func @_linear_act_kernel(%arg0: i32, %arg1: i32, %arg2: i32, %arg3: memref<8x128xf32, #tpu.memory_space<vmem>>, %arg4: memref<128x128xf32, #tpu.memory_space<vmem>>, %arg5: memref<1x128xf32, #tpu.memory_space<vmem>>, %arg6: memref<8x128xf32, #tpu.memory_space<vmem>>) attributes {dimension_semantics = [#tpu.dimension_semantics<parallel>, #tpu.dimension_semantics<parallel>, #tpu.dimension_semantics<arbitrary>], iteration_bounds = array<i64: 1, 1, 1>, scalar_prefetch = 0 : i64, scratch_operands = 0 : i64, tpu.core_type = #tpu.core_type<tc>, window_params = [{transform_indices = @transform_0, window_bounds = array<i64: 8, 128>}, {transform_indices = @transform_1, window_bounds = array<i64: 128, 128>}, {transform_indices = @transform_2, window_bounds = array<i64: 1, 128>}, {transform_indices = @transform_3, window_bounds = array<i64: 8, 128>}]} {
    %c0_i32 = arith.constant 0 : i32
    %0 = arith.cmpi eq, %arg2, %c0_i32 : i32
    %1 = arith.extui %0 : i1 to i32
    %c0_i32_0 = arith.constant 0 : i32
    %2 = arith.cmpi ne, %1, %c0_i32_0 : i32
    scf.if %2 {
      %cst_10 = arith.constant 0.000000e+00 : f32
      %12 = vector.broadcast %cst_10 : f32 to vector<8x128xf32>
      %c0_11 = arith.constant 0 : index
      %c0_12 = arith.constant 0 : index
      %13 = vector.load %arg6[%c0_11, %c0_12] : memref<8x128xf32, #tpu.memory_space<vmem>>, vector<8x128xf32>
      tpu.vector_store %arg6[%c0_11, %c0_12], %12 {strides = array<i32>} : memref<8x128xf32, #tpu.memory_space<vmem>>, vector<8x128xf32>,
    } else {
    }
    %c0 = arith.constant 0 : index
    %c0_1 = arith.constant 0 : index
    %3 = vector.load %arg3[%c0, %c0_1] : memref<8x128xf32, #tpu.memory_space<vmem>>, vector<8x128xf32>
    %c0_2 = arith.constant 0 : index
    %c0_3 = arith.constant 0 : index
    %4 = vector.load %arg4[%c0_2, %c0_3] : memref<128x128xf32, #tpu.memory_space<vmem>>, vector<128x128xf32>
    %c0_4 = arith.constant 0 : index
    %c0_5 = arith.constant 0 : index
    %5 = vector.load %arg6[%c0_4, %c0_5] : memref<8x128xf32, #tpu.memory_space<vmem>>, vector<8x128xf32>
    %cst = arith.constant dense<0.000000e+00> : vector<8x128xf32>
    %6 = tpu.matmul %3, %4, %cst {dimension_numbers = #tpu.dot_dimension_numbers<[1], [0], [0], [1], [0, 0, 1, 1], [], []>} : vector<8x128xf32>, vector<128x128xf32>, vector<8x128xf32> -> vector<8x128xf32>
    %7 = arith.addf %5, %6 : vector<8x128xf32>
    %c0_6 = arith.constant 0 : index
    %c0_7 = arith.constant 0 : index
    %8 = vector.load %arg6[%c0_6, %c0_7] : memref<8x128xf32, #tpu.memory_space<vmem>>, vector<8x128xf32>
    tpu.vector_store %arg6[%c0_6, %c0_7], %7 {strides = array<i32>} : memref<8x128xf32, #tpu.memory_space<vmem>>, vector<8x128xf32>,
    %c0_i32_8 = arith.constant 0 : i32
    %9 = arith.cmpi eq, %arg2, %c0_i32_8 : i32
    %10 = arith.extui %9 : i1 to i32
    %c0_i32_9 = arith.constant 0 : i32
    %11 = arith.cmpi ne, %10, %c0_i32_9 : i32
    scf.if %11 {
      %c0_10 = arith.constant 0 : index
      %c0_11 = arith.constant 0 : index
      %12 = vector.load %arg6[%c0_10, %c0_11] : memref<8x128xf32, #tpu.memory_space<vmem>>, vector<8x128xf32>
      %c0_12 = arith.constant 0 : index
      %c0_13 = arith.constant 0 : index
      %13 = vector.load %arg5[%c0_12, %c0_13] : memref<1x128xf32, #tpu.memory_space<vmem>>, vector<1x128xf32>
      %14 = vector.broadcast %13 : vector<1x128xf32> to vector<8x128xf32>
      %15 = arith.addf %12, %14 : vector<8x128xf32>
      %16 = arith.negf %15 : vector<8x128xf32>
      %17 = math.exp %16 : vector<8x128xf32>
      %cst_14 = arith.constant 1.000000e+00 : f32
      %18 = vector.broadcast %cst_14 : f32 to vector<8x128xf32>
      %19 = arith.addf %18, %17 : vector<8x128xf32>
      %20 = arith.divf %18, %19 : vector<8x128xf32>
      %c0_15 = arith.constant 0 : index
      %c0_16 = arith.constant 0 : index
      %21 = vector.load %arg6[%c0_15, %c0_16] : memref<8x128xf32, #tpu.memory_space<vmem>>, vector<8x128xf32>
      tpu.vector_store %arg6[%c0_15, %c0_16], %20 {strides = array<i32>} : memref<8x128xf32, #tpu.memory_space<vmem>>, vector<8x128xf32>,
    } else {
    }
    return
  }
  func.func @transform_0(%arg0: i32, %arg1: i32, %arg2: i32) -> (i32, i32) {
    %c0_i32 = arith.constant 0 : i32
    return %arg0, %arg2 : i32, i32
  }
  func.func @transform_1(%arg0: i32, %arg1: i32, %arg2: i32) -> (i32, i32) {
    %c0_i32 = arith.constant 0 : i32
    return %arg2, %arg1 : i32, i32
  }
  func.func @transform_2(%arg0: i32, %arg1: i32, %arg2: i32) -> (i32, i32) {
    %c0_i32 = arith.constant 0 : i32
    %c0_i32_0 = arith.constant 0 : i32
    return %c0_i32, %arg1 : i32, i32
  }
  func.func @transform_3(%arg0: i32, %arg1: i32, %arg2: i32) -> (i32, i32) {
    %c0_i32 = arith.constant 0 : i32
    return %arg0, %arg1 : i32, i32
  }
}

</mosaic_0001>

<bundles_post_ra>
// kernel: tpu_custom_call.1
= control target key start
LH: loop header
LB: loop body
LE: loop exit
PB: predicated region body
PF: predicated region fallthrough
CT: control target
= control target key end

     0   :  { %8 = vsyncpa [#allocation3], 0  ;;  %s341_s0 = inlined_call_operand.hbm [shape: f32[8,128], index: 0, kind: input, shape index: {}]   ;;  %s342_s1 = inlined_call_operand.hbm [shape: f32[128,128], index: 1, kind: input, shape index: {}]   ;;  %s343_s2 = inlined_call_operand.vmem [shape: f32[1,128], index: 2, kind: input, shape index: {}]   ;;  %s344_s3 = inlined_call_operand.hbm [shape: f32[8,128], index: 3, kind: output, shape index: {}]  }
   0x1   :  { %9 = vsyncpa [#allocation6], 0 }
   0x2   :  { %10 = vsyncpa [#allocation4], 0  ;;  %s302_s12 = smov [#allocation2]   ;;  %s303_s14 = smov [#allocation5]  }
   0x3   :  { %s17_s13 = sshll.u32 %s302_s12, 4  ;;  %s26_s15 = sshll.u32 %s303_s14, 4  ;;  %s18_s13 = int_to_ptr.vmem [resolvable:$true] %s17_s13  ;;  %s27_s15 = int_to_ptr.vmem [resolvable:$true] %s26_s15 }
   0x4   :  { %s244_s16 = scalar_lea.vmem %s18_s13, 128  ;;  %p249_p1 = scmp.lt.s32.totalorder %s18_s13, %s18_s13 }
   0x5   :  { %p245_p0 = scmp.ne.s32.totalorder %s18_s13, %s244_s16  ;;  %p250_p2 = scmp.lt.s32.totalorder %s244_s16, %s244_s16 }
   0x7   :  { %p251_p3 = por %p250_p2, %p249_p1 }
   0x9   :  { %p252_p4 = pnand %p251_p3, %p245_p0 }
   0xb   :  { %255 = shalt.err (!%p252_p4)
}
   0xc   :  { %20 = dma.hbm_to_vmem [thread:$0]  %s341_s0, 128, %s18_s13, [#allocation3]  }
   0xd   :  { %s264_s19 = scalar_lea.vmem %s27_s15, 2048  ;;  %p269_p6 = scmp.lt.s32.totalorder %s27_s15, %s27_s15 }
   0xe   :  { %p265_p5 = scmp.ne.s32.totalorder %s27_s15, %s264_s19  ;;  %p270_p7 = scmp.lt.s32.totalorder %s264_s19, %s264_s19 }
  0x10   :  { %p271_p8 = por %p270_p7, %p269_p6 }
  0x12   :  { %p272_p9 = pnand %p271_p8, %p265_p5 }
  0x14   :  { %275 = shalt.err (!%p272_p9)
}
  0x15   :  { %s304_s20 = smov 128   ;;  %s305_s21 = smov 8  }
  0x16   :  { %32 = dma.hbm_to_vmem [thread:$0]  %s342_s1, 2048, %s27_s15, [#allocation6], %s304_s20, %s304_s20, %s305_s21  }
  0x17   :  { %296 = dma.done.wait [#allocation3], 128  }
  0x18   :  { %297 = vsyncadd [#allocation3], 4294967168 }
  0x19   :  { %298 = dma.done.wait [#allocation6], 2048  }
  0x1a   :  { %299 = vsyncadd [#allocation6], 4294965248  ;;  %v306_v0 = vmov 0.0   ;;  %vm307_vm0 = vmmov 0   ;;  %v62_v1 = vld [vmem:[#allocation5 + $0x78] sm:$0xff]  ;;  %v61_v2 = vld [vmem:[#allocation5 + $0x70] sm:$0xff] }
  0x1b   :  { %190 = vmatprep.subr.mxu0 %v306_v0  ;;  %222 = vmatprep.mubr.msk.f32.mxu0 %vm307_vm0, %v306_v0  ;;  %v60_v3 = vld [vmem:[#allocation5 + $0x68] sm:$0xff]  ;;  %v59_v4 = vld [vmem:[#allocation5 + $0x60] sm:$0xff]  ;;  %v58_v5 = vld [vmem:[#allocation5 + $0x58] sm:$0xff]  ;;  %s308_s24 = smov [#allocation7]  }
  0x1c   :  { %191 = vmatpush3.msra.mxu0 %v62_v1  ;;  %v57_v6 = vld [vmem:[#allocation5 + $0x50] sm:$0xff]  ;;  %v56_v7 = vld [vmem:[#allocation5 + $0x48] sm:$0xff]  ;;  %v55_v8 = vld [vmem:[#allocation5 + $0x40] sm:$0xff]  ;;  %s161_s25 = sshll.u32 %s308_s24, 4  ;;  %s162_s25 = int_to_ptr.vmem [resolvable:$true] %s161_s25 }
  0x1d   :  { %192 = vmatprep.subr.mxu0 %v306_v0  ;;  %v54_v9 = vld [vmem:[#allocation5 + $0x38] sm:$0xff]  ;;  %v53_v10 = vld [vmem:[#allocation5 + $0x30] sm:$0xff]  ;;  %v52_v11 = vld [vmem:[#allocation5 + $0x28] sm:$0xff]  ;;  %s276_s26 = scalar_lea.vmem %s162_s25, 128  ;;  %p281_p11 = scmp.lt.s32.totalorder %s162_s25, %s162_s25 }
  0x1e   :  { %193 = vmatpush3.msra.mxu0 %v61_v2  ;;  %v51_v12 = vld [vmem:[#allocation5 + $0x20] sm:$0xff]  ;;  %v50_v13 = vld [vmem:[#allocation5 + $0x18] sm:$0xff]  ;;  %v49_v14 = vld [vmem:[#allocation5 + $0x10] sm:$0xff]  ;;  %p277_p10 = scmp.ne.s32.totalorder %s162_s25, %s276_s26  ;;  %p282_p12 = scmp.lt.s32.totalorder %s276_s26, %s276_s26 }
  0x1f   :  { %194 = vmatprep.subr.mxu0 %v306_v0  ;;  %v48_v15 = vld [vmem:[#allocation5 + $0x8] sm:$0xff]  ;;  %v47_v16 = vld [vmem:[#allocation5] sm:$0xff]  ;;  %v46_v17 = vld [vmem:[#allocation2] sm:$0xff] }
  0x20   :  { %195 = vmatpush3.msra.mxu0 %v60_v3  ;;  %v171_v19 = vld [vmem:[%s343_s2] ss:$0 sm:$0xff]  ;;  %p283_p13 = por %p282_p12, %p281_p11 }
  0x21   :  { %196 = vmatprep.subr.mxu0 %v306_v0 }
  0x22   :  { %197 = vmatpush3.msra.mxu0 %v59_v4  ;;  %p284_p0 = pnand %p283_p13, %p277_p10 }
  0x23   :  { %198 = vmatprep.subr.mxu0 %v306_v0 }
  0x24   :  { %199 = vmatpush3.msra.mxu0 %v58_v5 }
  0x25   :  { %200 = vmatprep.subr.mxu0 %v306_v0 }
  0x26   :  { %201 = vmatpush3.msra.mxu0 %v57_v6 }
  0x27   :  { %202 = vmatprep.subr.mxu0 %v306_v0 }
  0x28   :  { %203 = vmatpush3.msra.mxu0 %v56_v7 }
  0x29   :  { %204 = vmatprep.subr.mxu0 %v306_v0 }
  0x2a   :  { %205 = vmatpush3.msra.mxu0 %v55_v8 }
  0x2b   :  { %206 = vmatprep.subr.mxu0 %v306_v0 }
  0x2c   :  { %207 = vmatpush3.msra.mxu0 %v54_v9 }
  0x2d   :  { %208 = vmatprep.subr.mxu0 %v306_v0 }
  0x2e   :  { %209 = vmatpush3.msra.mxu0 %v53_v10 }
  0x2f   :  { %210 = vmatprep.subr.mxu0 %v306_v0 }
  0x30   :  { %211 = vmatpush3.msra.mxu0 %v52_v11 }
  0x31   :  { %212 = vmatprep.subr.mxu0 %v306_v0 }
  0x32   :  { %213 = vmatpush3.msra.mxu0 %v51_v12 }
  0x33   :  { %214 = vmatprep.subr.mxu0 %v306_v0 }
  0x34   :  { %215 = vmatpush3.msra.mxu0 %v50_v13 }
  0x35   :  { %216 = vmatprep.subr.mxu0 %v306_v0 }
  0x36   :  { %217 = vmatpush3.msra.mxu0 %v49_v14 }
  0x37   :  { %218 = vmatprep.subr.mxu0 %v306_v0 }
  0x38   :  { %219 = vmatpush3.msra.mxu0 %v48_v15 }
  0x39   :  { %220 = vmatprep.subr.mxu0 %v306_v0 }
  0x3a   :  { %221 = vmatpush3.msra.mxu0 %v47_v16 }
  0x3b   :  { %223 = vmatmul.mubr.f32.vlgmr.msra.gmra.mxu0 %v46_v17 }
  0xfb   :  { %v130_v18 = vpop.f32.mrf.mxu0 }
  0xfc   :  { %v147_v21 = vadd.f32 %v171_v19, %v130_v18 }
  0xfd   :  { %v224_v20 = vpop.f32.mrf.mxu0 }
  0xfe   :  { %v172_v22 = vmul.f32 -1.442695, %v147_v21 }
 0x100   :  { %232 = vpow2.f32 %v172_v22 }
 0x10d   :  { %v233_v23 = vpop.eup %232 }
 0x10e   :  { %v151_v24 = vadd.f32 1.0, %v233_v23 }
 0x110   :  { %234 = vrcp.f32 %v151_v24 }
 0x11d   :  { %v235_v25 = vpop.eup %234 }
 0x11e   :  { %154 = vst [vmem:[#allocation7] sm:$0xff] %v235_v25 }
 0x11f   :  { %287 = shalt.err (!%p284_p0)
}
 0x120   :  { %164 = dma.vmem_to_hbm [thread:$0]  %s162_s25, 128, %s344_s3, [#allocation4]  }
 0x121   :  { %300 = dma.done.wait [#allocation4], 128  }
 0x122   :  { %301 = vsyncadd [#allocation4], 4294967168 }
 0x123   :  { %168 = vsyncpa [#allocation3], 1 }
 0x124   :  { %169 = vsyncpa [#allocation6], 1 }
 0x125   :  { %170 = vsyncpa [#allocation4], 1 }

</bundles_post_ra>
